<compile_context>
chip_gen: v7x
topology: tpu7x:2x2x1
jax: 0.10.0
libtpu: 0.0.40
codegen_flags: <defaults>
</compile_context>

<pallas_src>
import math

import jax
import jax.numpy as jnp
from jax.experimental import pallas as pl
from jax.experimental.pallas import tpu as pltpu

_MAX_DMAS = 8                       # spread big copies over several DMA engines
_TARGET_DMA_BYTES = 4 * 1024 * 1024 # aim for >= ~4 MiB per DMA chunk


def _make_dma_copy_kernel(starts, sizes):
    """Build a kernel that copies src -> dst directly in HBM via async DMAs.

    `starts` / `sizes` are *static* Python row-chunk boundaries, so the traced
    body issues a fixed set of large contiguous HBM->HBM copies and then waits
    on all of them (start-all-then-wait-all overlaps the DMA engines).
    """

    def kernel(src_hbm, dst_hbm, sems):
        copies = []
        for k, (s, sz) in enumerate(zip(starts, sizes)):
            cp = pltpu.make_async_copy(
                src_hbm.at[pl.ds(s, sz)],
                dst_hbm.at[pl.ds(s, sz)],
                sems.at[k],
            )
            cp.start()
            copies.append(cp)
        for cp in copies:
            cp.wait()

    return kernel


def flatten_pallas(x: jax.Array) -> jax.Array:
    """Pallas equivalent of torch `input.view(input.size(0), -1)`."""
    n = x.shape[0]
    feat = math.prod(x.shape[1:]) if x.ndim > 1 else 1

    # Metadata-only reshape; this *is* the flatten.
    x2d = x.reshape(n, feat)

    total = n * feat
    if total == 0:
        return x2d  # nothing to copy

    itemsize = jnp.dtype(x.dtype).itemsize

    # View the flat element stream as (rows, 128) when possible so row chunks
    # are large contiguous byte ranges independent of the batch size; for
    # non-128-divisible totals chunk whole (feat,)-rows of the 2-D view
    # (the DMA engine does not care about lane/sublane density).
    if total % 128 == 0:
        rows, cols = total // 128, 128
    else:
        rows, cols = n, feat
    flat = x2d.reshape(rows, cols)

    # Static, near-equal row chunks: one DMA (and one semaphore) each.
    bytes_per_row = cols * itemsize
    rows_per_target = max(1, _TARGET_DMA_BYTES // bytes_per_row)
    want_chunks = -(-rows // rows_per_target)  # ceil div
    num_chunks = max(1, min(_MAX_DMAS, rows, want_chunks))

    base, rem = divmod(rows, num_chunks)
    starts, sizes, off = [], [], 0
    for k in range(num_chunks):
        sz = base + (1 if k < rem else 0)
        starts.append(off)
        sizes.append(sz)
        off += sz

    out = pl.pallas_call(
        _make_dma_copy_kernel(starts, sizes),
        out_shape=jax.ShapeDtypeStruct((rows, cols), x.dtype),
        in_specs=[pl.BlockSpec(memory_space=pl.ANY)],   # raw HBM ref, no auto-DMA
        out_specs=pl.BlockSpec(memory_space=pl.ANY),
        scratch_shapes=[pltpu.SemaphoreType.DMA((num_chunks,))],
        compiler_params=pltpu.CompilerParams(has_side_effects=True),
        cost_estimate=pl.CostEstimate(
            flops=0, transcendentals=0, bytes_accessed=2 * total * itemsize
        ),
    )(flat)
    return out.reshape(n, feat)


if __name__ == "__main__":
    key = jax.random.PRNGKey(0)

    # Small NCHW input: batch=2, channels=4, spatial=16x16 (lane-dense path).
    x = jax.random.normal(key, (2, 4, 16, 16), dtype=jnp.float32)
    y = jax.block_until_ready(flatten_pallas(x))
    ref = x.reshape(x.shape[0], -1)
    assert y.shape == (2, 4 * 16 * 16), y.shape
    assert y.dtype == x.dtype
    assert jnp.array_equal(y, ref), "mismatch vs reference flatten (128-divisible)"

    # Odd shape exercising the non-128-divisible path.
    x2 = jax.random.normal(jax.random.PRNGKey(0), (2, 3, 5, 7), dtype=jnp.float32)
    y2 = jax.block_until_ready(flatten_pallas(x2))
    ref2 = x2.reshape(x2.shape[0], -1)
    assert y2.shape == (2, 3 * 5 * 7), y2.shape
    assert jnp.array_equal(y2, ref2), "mismatch vs reference flatten (ragged)"

    # Sub-32-bit dtype (bf16) — DMA copy is dtype-agnostic.
    x3 = jax.random.normal(jax.random.PRNGKey(0), (2, 4, 8, 8), dtype=jnp.bfloat16)
    y3 = jax.block_until_ready(flatten_pallas(x3))
    ref3 = x3.reshape(x3.shape[0], -1)
    assert y3.dtype == jnp.bfloat16
    assert jnp.array_equal(y3, ref3), "mismatch vs reference flatten (bf16)"

    print("KERNEL_OK")
</pallas_src>

<mosaic_0001>
module attributes {stable_mosaic.version = 11 : i64} {
  func.func @kernel(%arg0: memref<16x128xf32, #tpu.memory_space<any>>, %arg1: memref<16x128xf32, #tpu.memory_space<any>>, %arg2: memref<1x!tpu.dma_semaphore, #tpu.memory_space<semaphore_mem>>) attributes {dimension_semantics = [], scalar_prefetch = 0 : i64, scratch_operands = 1 : i64, tpu.core_type = #tpu.core_type<tc>} {
    %c0_i32 = arith.constant 0 : i32
    %c0_i32_0 = arith.constant 0 : i32
    %c0_i32_1 = arith.constant 0 : i32
    %0 = tpu.memref_slice %arg0[%c0_i32_0, %c0_i32_1] : memref<16x128xf32, #tpu.memory_space<any>> -> memref<16x128xf32, #tpu.memory_space<any>>
    %c0_i32_2 = arith.constant 0 : i32
    %c0_i32_3 = arith.constant 0 : i32
    %1 = tpu.memref_slice %arg1[%c0_i32_2, %c0_i32_3] : memref<16x128xf32, #tpu.memory_space<any>> -> memref<16x128xf32, #tpu.memory_space<any>>
    %2 = tpu.memref_slice %arg2[%c0_i32] : memref<1x!tpu.dma_semaphore, #tpu.memory_space<semaphore_mem>> -> memref<1x!tpu.dma_semaphore, #tpu.memory_space<semaphore_mem>>
    %3 = tpu.memref_squeeze %2 : memref<1x!tpu.dma_semaphore, #tpu.memory_space<semaphore_mem>> -> memref<!tpu.dma_semaphore, #tpu.memory_space<semaphore_mem>>
    tpu.enqueue_dma source(%0 : memref<16x128xf32, #tpu.memory_space<any>>) target(%1 : memref<16x128xf32, #tpu.memory_space<any>>) target_semaphore(%3 : memref<!tpu.dma_semaphore, #tpu.memory_space<semaphore_mem>>)
    %c0_i32_4 = arith.constant 0 : i32
    %c0_i32_5 = arith.constant 0 : i32
    %c0_i32_6 = arith.constant 0 : i32
    %4 = tpu.memref_slice %arg0[%c0_i32_5, %c0_i32_6] : memref<16x128xf32, #tpu.memory_space<any>> -> memref<16x128xf32, #tpu.memory_space<any>>
    %c0_i32_7 = arith.constant 0 : i32
    %c0_i32_8 = arith.constant 0 : i32
    %5 = tpu.memref_slice %arg1[%c0_i32_7, %c0_i32_8] : memref<16x128xf32, #tpu.memory_space<any>> -> memref<16x128xf32, #tpu.memory_space<any>>
    %6 = tpu.memref_slice %arg2[%c0_i32_4] : memref<1x!tpu.dma_semaphore, #tpu.memory_space<semaphore_mem>> -> memref<1x!tpu.dma_semaphore, #tpu.memory_space<semaphore_mem>>
    %7 = tpu.memref_squeeze %6 : memref<1x!tpu.dma_semaphore, #tpu.memory_space<semaphore_mem>> -> memref<!tpu.dma_semaphore, #tpu.memory_space<semaphore_mem>>
    tpu.wait_dma2 semaphore(%7 : memref<!tpu.dma_semaphore, #tpu.memory_space<semaphore_mem>>) src(%4 : memref<16x128xf32, #tpu.memory_space<any>>) dst(%5 : memref<16x128xf32, #tpu.memory_space<any>>)
    return
  }
}

</mosaic_0001>

<bundles_post_ra>
// kernel: tpu_custom_call.1
= control target key start
LH: loop header
LB: loop body
LE: loop exit
PB: predicated region body
PF: predicated region fallthrough
CT: control target
= control target key end

     0   :  { %s34_s6 = smov [#allocation2]   ;;  %s35_s7 = smov [#allocation3]   ;;  %s53_s0 = inlined_call_operand.hbm [shape: f32[16,128], index: 0, kind: input, shape index: {}]   ;;  %s54_s1 = inlined_call_operand.hbm [shape: f32[16,128], index: 1, kind: output, shape index: {}]  }
   0x1   :  { %s36_s8 = smov 0  }
   0x2   :  { %18 = dma.general %s53_s0, 256, %s54_s1, %s34_s6, %s35_s7, [#allocation4], %s36_s8, 0  }
   0x3   :  { %32 = dma.done.wait [#allocation2], 256 }
   0x4   :  { %33 = vsyncadd [#allocation2], 4294967040 }
   0x5   :  { %22 = vsyncmov [#allocation2] }
   0x8   :  { %s23_s13 = vpop.sfrf %22 }
   0x9   :  { %p28_p0 = scmp.ne.s32.totalorder %s23_s13, 0 }
   0xb   :  { %27 = shalt.err (%p28_p0)  }

</bundles_post_ra>
